<compile_context>
chip_gen: v5e
topology: v5e:2x2
jax: 0.10.0
libtpu: 0.0.40
codegen_flags: <defaults>
</compile_context>

<pallas_src>
import functools

import jax
import jax.numpy as jnp
import numpy as np
from jax import lax
from jax.experimental import pallas as pl
from jax.experimental.pallas import tpu as pltpu


def _round_up(x: int, m: int) -> int:
    return ((x + m - 1) // m) * m


def _ece_kernel(sm_ref, lab_ref, out_ref, counts_ref, csum_ref, asum_ref, *,
                n_bins: int, n_valid: int, tile_n: int, chunk_n: int,
                num_chunks: int):
    # sm_ref : (C, tile_n)  caller dtype; classes on sublanes, samples on lanes
    # lab_ref: (1, tile_n)  int32 labels, lane-dense
    step = pl.program_id(0)

    @pl.when(step == 0)
    def _init():
        counts_ref[...] = jnp.zeros_like(counts_ref)
        csum_ref[...] = jnp.zeros_like(csum_ref)
        asum_ref[...] = jnp.zeros_like(asum_ref)

    c = sm_ref.shape[0]

    # Bin boundaries generated in-kernel (no captured array constants):
    # lower_i = i / n_bins, upper_i = (i+1) / n_bins (== torch.linspace(0,1,n+1)).
    b = lax.broadcasted_iota(jnp.int32, (n_bins, 1), 0).astype(jnp.float32)
    lowers = b / n_bins                                        # (nb, 1)
    uppers = (b + 1.0) / n_bins                                # (nb, 1)

    # Hoisted iotas (JAX does not CSE broadcast_in_dim inside the loop).
    cls_iota = lax.broadcasted_iota(jnp.int32, (c, chunk_n), 0)
    lane_iota = lax.broadcasted_iota(jnp.int32, (1, chunk_n), 1)

    def process_chunk(t):
        start = t * chunk_n
        if not isinstance(start, int):
            start = pl.multiple_of(start, chunk_n)
        sm = sm_ref[:, pl.ds(start, chunk_n)].astype(jnp.float32)   # (C, CH)
        lab = lab_ref[:, pl.ds(start, chunk_n)]                     # (1, CH) i32

        # confidences = max over classes; predictions = first argmax (torch
        # tie-break).  All index math stays in int32.
        conf = jnp.max(sm, axis=0, keepdims=True)                   # (1, CH)
        pred = jnp.min(jnp.where(sm == conf, cls_iota, c),
                       axis=0, keepdims=True)                       # (1, CH) i32
        acc = (pred == lab).astype(jnp.float32)                     # (1, CH)

        # Ragged-tail mask: out-of-bounds lanes (garbage from the partial
        # block DMA) get conf = 0, which lies in no bin (the first bin is
        # (0, 1/n_bins]), so they contribute nothing to any accumulator.
        gidx = step * tile_n + start + lane_iota
        conf = jnp.where(gidx < n_valid, conf, 0.0)

        # membership: conf > lower AND conf <= upper -> (nb, CH), lane-dense.
        in_bin = ((conf > lowers) & (conf <= uppers)).astype(jnp.float32)

        counts_ref[...] += jnp.sum(in_bin, axis=1, keepdims=True)          # (nb,1)
        csum_ref[...] += jnp.sum(in_bin * conf, axis=1, keepdims=True)     # (nb,1)
        asum_ref[...] += jnp.sum(in_bin * acc, axis=1, keepdims=True)      # (nb,1)

    if num_chunks == 1:
        process_chunk(0)
    else:
        def body(t, carry):
            process_chunk(t)
            return carry
        lax.fori_loop(0, num_chunks, body, 0)

    # The output index_map is constant, so the (1,1) block stays resident
    # across the whole sequential ("arbitrary") grid; write it once at the end.
    @pl.when(step == pl.num_programs(0) - 1)
    def _finalize():
        counts = counts_ref[...]
        prop_in_bin = counts / jnp.float32(n_valid)
        safe = jnp.maximum(counts, 1.0)
        gap = jnp.abs(csum_ref[...] / safe - asum_ref[...] / safe)
        contrib = jnp.where(counts > 0.0, gap * prop_in_bin, 0.0)
        out_ref[...] = jnp.sum(contrib, axis=0, keepdims=True)


def ece_loss(softmaxes, labels, n_bins: int = 10, tile_n=None, chunk_n: int = 2048):
    """Expected Calibration Error (forward of the torch ECELoss module).

    softmaxes: (N, C) probabilities (f32 or bf16; kept in the caller's dtype).
    labels:    (N,) class ids, or (N, C) scores/one-hot (argmax is taken).
    Returns a (1,) float32 array, matching the torch module.
    """
    if labels.ndim > 1:
        labels = jnp.argmax(labels, axis=1)
    labels = labels.astype(jnp.int32)

    n, c = softmaxes.shape
    itemsize = jnp.dtype(softmaxes.dtype).itemsize

    # Lane-dense kernel layout: classes on sublanes, samples on lanes.
    sm_t = softmaxes.T                       # (C, N): one XLA transpose pass
    lab = labels.reshape(1, n)               # free reshape (metadata only)

    # ---- tile / chunk selection -------------------------------------------
    try:
        vmem_cap = int(pltpu.get_tpu_info().vmem_capacity_bytes)
    except Exception:
        vmem_cap = 64 * 1024 * 1024          # conservative (v7x-sized) fallback

    # Double-buffered per-sample VMEM cost: softmax column (C padded to the
    # dtype's sublane tile) + 32 B for the 1->8 sublane-padded labels row.
    subl = max(1, 32 // max(itemsize, 1))
    sm_col = _round_up(c, subl) * itemsize
    per_sample = 2 * (sm_col + 32)

    n_pad128 = _round_up(max(n, 1), 128)
    if tile_n is None:
        block_budget = min(24 * 1024 * 1024, vmem_cap // 3)
        t = block_budget // per_sample
        tile_n = max(128, min(128 * 1024, (t // 128) * 128))
    else:
        tile_n = max(128, _round_up(int(tile_n), 128))
    tile_n = min(tile_n, n_pad128)

    chunk_n = max(128, min(_round_up(int(chunk_n), 128), tile_n))
    tile_n = _round_up(tile_n, chunk_n)      # tile = whole number of chunks
    num_chunks = tile_n // chunk_n
    grid = pl.cdiv(n, tile_n)

    footprint = tile_n * per_sample          # double-buffered input blocks
    vmem_limit = min(vmem_cap,
                     max(32 * 1024 * 1024, footprint + 8 * 1024 * 1024))

    kernel = functools.partial(_ece_kernel, n_bins=n_bins, n_valid=n,
                               tile_n=tile_n, chunk_n=chunk_n,
                               num_chunks=num_chunks)
    out = pl.pallas_call(
        kernel,
        out_shape=jax.ShapeDtypeStruct((1, 1), jnp.float32),
        grid_spec=pltpu.PrefetchScalarGridSpec(
            num_scalar_prefetch=0,
            grid=(grid,),
            in_specs=[
                pl.BlockSpec((c, tile_n), lambda i: (0, i)),   # softmaxes.T tile
                pl.BlockSpec((1, tile_n), lambda i: (0, i)),   # labels row tile
            ],
            out_specs=pl.BlockSpec((1, 1), lambda i: (0, 0)),
            scratch_shapes=[
                pltpu.VMEM((n_bins, 1), jnp.float32),   # per-bin counts
                pltpu.VMEM((n_bins, 1), jnp.float32),   # per-bin sum(confidence)
                pltpu.VMEM((n_bins, 1), jnp.float32),   # per-bin sum(accuracy)
            ],
        ),
        compiler_params=pltpu.CompilerParams(
            dimension_semantics=("arbitrary",),   # sequential bin accumulation
            vmem_limit_bytes=int(vmem_limit),
        ),
    )(sm_t, lab)
    return out.reshape(1)


def _ece_reference(softmaxes, labels, n_bins=10):
    """Pure-JAX reference mirroring the PyTorch loop, for correctness checks."""
    if labels.ndim > 1:
        labels = jnp.argmax(labels, axis=1)
    softmaxes = softmaxes.astype(jnp.float32)
    conf = jnp.max(softmaxes, axis=1)
    pred = jnp.argmin(jnp.where(softmaxes == conf[:, None],
                                jnp.arange(softmaxes.shape[1]),
                                softmaxes.shape[1]), axis=1)
    acc = (pred == labels).astype(jnp.float32)
    bounds = np.linspace(0.0, 1.0, n_bins + 1).astype(np.float32)
    ece = jnp.zeros((1,), jnp.float32)
    for lo, hi in zip(bounds[:-1], bounds[1:]):
        in_bin = (conf > lo) & (conf <= hi)
        prop = jnp.mean(in_bin.astype(jnp.float32))
        cnt = jnp.sum(in_bin.astype(jnp.float32))
        safe = jnp.maximum(cnt, 1.0)
        acc_b = jnp.sum(acc * in_bin) / safe
        conf_b = jnp.sum(conf * in_bin) / safe
        ece = ece + jnp.where(cnt > 0, jnp.abs(conf_b - acc_b) * prop, 0.0)
    return ece


if __name__ == "__main__":
    key = jax.random.PRNGKey(0)
    k1, k2, k3, k4 = jax.random.split(key, 4)

    # 1) small f32 case: 64 samples, 8 classes (single tile, single chunk,
    #    ragged tail inside the 128-lane block is masked in-kernel).
    N, C = 64, 8
    logits = jax.random.normal(k1, (N, C), dtype=jnp.float32)
    softmaxes = jax.nn.softmax(logits, axis=1)
    labels = jax.random.randint(k2, (N,), 0, C, dtype=jnp.int32)

    ece = ece_loss(softmaxes, labels, n_bins=10)
    jax.block_until_ready(ece)
    ref = _ece_reference(softmaxes, labels, n_bins=10)
    assert ece.shape == (1,)
    assert np.allclose(np.asarray(ece), np.asarray(ref), atol=1e-5), (ece, ref)

    # one-hot labels path (torch's `if len(labels.shape) > 1` branch)
    ece_oh = ece_loss(softmaxes, jax.nn.one_hot(labels, C), n_bins=10)
    jax.block_until_ready(ece_oh)
    assert np.allclose(np.asarray(ece_oh), np.asarray(ref), atol=1e-5)

    # 2) bf16 input, small explicit tile -> 3 grid steps with a ragged final
    #    block (cross-step accumulation + in-kernel tail masking, no padding).
    N2, C2 = 300, 10
    logits2 = jax.random.normal(k3, (N2, C2), dtype=jnp.float32)
    sm2 = jax.nn.softmax(logits2, axis=1).astype(jnp.bfloat16)
    labels2 = jax.random.randint(k2, (N2,), 0, C2, dtype=jnp.int32)
    ece2 = ece_loss(sm2, labels2, n_bins=10, tile_n=128)
    jax.block_until_ready(ece2)
    ref2 = _ece_reference(sm2.astype(jnp.float32), labels2, n_bins=10)
    assert np.allclose(np.asarray(ece2), np.asarray(ref2), atol=1e-4), (ece2, ref2)

    # 3) f32, default tile -> one grid step, several inner fori_loop chunks
    #    with a masked ragged tail inside the tile.
    N3, C3 = 5000, 10
    logits3 = jax.random.normal(k4, (N3, C3), dtype=jnp.float32)
    sm3 = jax.nn.softmax(logits3, axis=1)
    labels3 = jax.random.randint(k2, (N3,), 0, C3, dtype=jnp.int32)
    ece3 = ece_loss(sm3, labels3, n_bins=10)
    jax.block_until_ready(ece3)
    ref3 = _ece_reference(sm3, labels3, n_bins=10)
    assert np.allclose(np.asarray(ece3), np.asarray(ref3), atol=1e-4), (ece3, ref3)

    print("KERNEL_OK")
</pallas_src>

<mosaic_0001>
module attributes {stable_mosaic.version = 11 : i64} {
  func.func @_ece_kernel(%arg0: i32, %arg1: memref<8x128xf32, #tpu.memory_space<vmem>>, %arg2: memref<1x128xi32, #tpu.memory_space<vmem>>, %arg3: memref<1x1xf32, #tpu.memory_space<vmem>>, %arg4: memref<10x1xf32, #tpu.memory_space<vmem>>, %arg5: memref<10x1xf32, #tpu.memory_space<vmem>>, %arg6: memref<10x1xf32, #tpu.memory_space<vmem>>) attributes {dimension_semantics = [#tpu.dimension_semantics<arbitrary>], iteration_bounds = array<i64: 1>, scalar_prefetch = 0 : i64, scratch_operands = 3 : i64, tpu.core_type = #tpu.core_type<tc>, window_params = [{transform_indices = @transform_0, window_bounds = array<i64: 8, 128>}, {transform_indices = @transform_1, window_bounds = array<i64: 1, 128>}, {pipeline_mode = #tpu.pipeline_mode<synchronous>, transform_indices = @transform_2, window_bounds = array<i64: 1, 1>}]} {
    %c0_i32 = arith.constant 0 : i32
    %0 = arith.cmpi eq, %arg0, %c0_i32 : i32
    %1 = arith.extui %0 : i1 to i32
    %c0_i32_0 = arith.constant 0 : i32
    %2 = arith.cmpi ne, %1, %c0_i32_0 : i32
    scf.if %2 {
      %cst_27 = arith.constant 0.000000e+00 : f32
      %65 = vector.broadcast %cst_27 : f32 to vector<10x1xf32>
      %c0_28 = arith.constant 0 : index
      %c0_29 = arith.constant 0 : index
      %66 = vector.load %arg4[%c0_28, %c0_29] : memref<10x1xf32, #tpu.memory_space<vmem>>, vector<10x1xf32>
      tpu.vector_store %arg4[%c0_28, %c0_29], %65 {strides = array<i32>} : memref<10x1xf32, #tpu.memory_space<vmem>>, vector<10x1xf32>,
      %cst_30 = arith.constant 0.000000e+00 : f32
      %67 = vector.broadcast %cst_30 : f32 to vector<10x1xf32>
      %c0_31 = arith.constant 0 : index
      %c0_32 = arith.constant 0 : index
      %68 = vector.load %arg5[%c0_31, %c0_32] : memref<10x1xf32, #tpu.memory_space<vmem>>, vector<10x1xf32>
      tpu.vector_store %arg5[%c0_31, %c0_32], %67 {strides = array<i32>} : memref<10x1xf32, #tpu.memory_space<vmem>>, vector<10x1xf32>,
      %cst_33 = arith.constant 0.000000e+00 : f32
      %69 = vector.broadcast %cst_33 : f32 to vector<10x1xf32>
      %c0_34 = arith.constant 0 : index
      %c0_35 = arith.constant 0 : index
      %70 = vector.load %arg6[%c0_34, %c0_35] : memref<10x1xf32, #tpu.memory_space<vmem>>, vector<10x1xf32>
      tpu.vector_store %arg6[%c0_34, %c0_35], %69 {strides = array<i32>} : memref<10x1xf32, #tpu.memory_space<vmem>>, vector<10x1xf32>,
    } else {
    }
    %3 = tpu.iota {dimensions = array<i32: 0>} : vector<10x1xi32>
    %4 = arith.sitofp %3 : vector<10x1xi32> to vector<10x1xf32>
    %cst = arith.constant 1.000000e+01 : f32
    %5 = vector.broadcast %cst : f32 to vector<10x1xf32>
    %6 = arith.divf %4, %5 : vector<10x1xf32>
    %cst_1 = arith.constant 1.000000e+00 : f32
    %7 = vector.broadcast %cst_1 : f32 to vector<10x1xf32>
    %8 = arith.addf %4, %7 : vector<10x1xf32>
    %cst_2 = arith.constant 1.000000e+01 : f32
    %9 = vector.broadcast %cst_2 : f32 to vector<10x1xf32>
    %10 = arith.divf %8, %9 : vector<10x1xf32>
    %11 = tpu.iota {dimensions = array<i32: 0>} : vector<8x128xi32>
    %12 = tpu.iota {dimensions = array<i32: 1>} : vector<1x128xi32>
    %c0 = arith.constant 0 : index
    %c0_3 = arith.constant 0 : index
    %13 = vector.load %arg1[%c0, %c0_3] : memref<8x128xf32, #tpu.memory_space<vmem>>, vector<8x128xf32>
    %c0_4 = arith.constant 0 : index
    %c0_5 = arith.constant 0 : index
    %14 = vector.load %arg2[%c0_4, %c0_5] : memref<1x128xi32, #tpu.memory_space<vmem>>, vector<1x128xi32>
    %cst_6 = arith.constant dense<0xFF800000> : vector<128xf32>
    %15 = vector.multi_reduction <maximumf>, %13, %cst_6 [0] : vector<8x128xf32> to vector<128xf32>
    %16 = vector.shape_cast %15 : vector<128xf32> to vector<1x128xf32>
    %17 = vector.broadcast %16 : vector<1x128xf32> to vector<8x128xf32>
    %18 = arith.cmpf oeq, %13, %17 : vector<8x128xf32>
    %c8_i32 = arith.constant 8 : i32
    %19 = vector.broadcast %c8_i32 : i32 to vector<8x128xi32>
    %20 = arith.select %18, %11, %19 : vector<8x128xi1>, vector<8x128xi32>
    %cst_7 = arith.constant dense<2147483647> : vector<128xi32>
    %21 = vector.multi_reduction <minsi>, %20, %cst_7 [0] : vector<8x128xi32> to vector<128xi32>
    %22 = vector.shape_cast %21 : vector<128xi32> to vector<1x128xi32>
    %23 = arith.cmpi eq, %22, %14 : vector<1x128xi32>
    %24 = arith.extui %23 : vector<1x128xi1> to vector<1x128xi32>
    %25 = arith.sitofp %24 : vector<1x128xi32> to vector<1x128xf32>
    %c128_i32 = arith.constant 128 : i32
    %26 = arith.muli %arg0, %c128_i32 : i32
    %c0_i32_8 = arith.constant 0 : i32
    %27 = arith.addi %26, %c0_i32_8 : i32
    %28 = vector.broadcast %27 : i32 to vector<1x128xi32>
    %29 = arith.addi %28, %12 : vector<1x128xi32>
    %c64_i32 = arith.constant 64 : i32
    %30 = vector.broadcast %c64_i32 : i32 to vector<1x128xi32>
    %31 = arith.cmpi slt, %29, %30 : vector<1x128xi32>
    %cst_9 = arith.constant 0.000000e+00 : f32
    %32 = vector.broadcast %cst_9 : f32 to vector<1x128xf32>
    %33 = arith.select %31, %16, %32 : vector<1x128xi1>, vector<1x128xf32>
    %34 = vector.broadcast %33 : vector<1x128xf32> to vector<10x128xf32>
    %35 = vector.broadcast %6 : vector<10x1xf32> to vector<10x128xf32>
    %36 = arith.cmpf ogt, %34, %35 : vector<10x128xf32>
    %37 = vector.broadcast %33 : vector<1x128xf32> to vector<10x128xf32>
    %38 = vector.broadcast %10 : vector<10x1xf32> to vector<10x128xf32>
    %39 = arith.cmpf ole, %37, %38 : vector<10x128xf32>
    %40 = arith.andi %36, %39 : vector<10x128xi1>
    %41 = arith.extui %40 : vector<10x128xi1> to vector<10x128xi32>
    %42 = arith.sitofp %41 : vector<10x128xi32> to vector<10x128xf32>
    %c0_10 = arith.constant 0 : index
    %c0_11 = arith.constant 0 : index
    %43 = vector.load %arg4[%c0_10, %c0_11] : memref<10x1xf32, #tpu.memory_space<vmem>>, vector<10x1xf32>
    %cst_12 = arith.constant dense<0.000000e+00> : vector<10xf32>
    %44 = vector.multi_reduction <add>, %42, %cst_12 [1] : vector<10x128xf32> to vector<10xf32>
    %45 = vector.shape_cast %44 : vector<10xf32> to vector<10x1xf32>
    %46 = arith.addf %43, %45 : vector<10x1xf32>
    %c0_13 = arith.constant 0 : index
    %c0_14 = arith.constant 0 : index
    %47 = vector.load %arg4[%c0_13, %c0_14] : memref<10x1xf32, #tpu.memory_space<vmem>>, vector<10x1xf32>
    tpu.vector_store %arg4[%c0_13, %c0_14], %46 {strides = array<i32>} : memref<10x1xf32, #tpu.memory_space<vmem>>, vector<10x1xf32>,
    %c0_15 = arith.constant 0 : index
    %c0_16 = arith.constant 0 : index
    %48 = vector.load %arg5[%c0_15, %c0_16] : memref<10x1xf32, #tpu.memory_space<vmem>>, vector<10x1xf32>
    %49 = vector.broadcast %33 : vector<1x128xf32> to vector<10x128xf32>
    %50 = arith.mulf %42, %49 : vector<10x128xf32>
    %cst_17 = arith.constant dense<0.000000e+00> : vector<10xf32>
    %51 = vector.multi_reduction <add>, %50, %cst_17 [1] : vector<10x128xf32> to vector<10xf32>
    %52 = vector.shape_cast %51 : vector<10xf32> to vector<10x1xf32>
    %53 = arith.addf %48, %52 : vector<10x1xf32>
    %c0_18 = arith.constant 0 : index
    %c0_19 = arith.constant 0 : index
    %54 = vector.load %arg5[%c0_18, %c0_19] : memref<10x1xf32, #tpu.memory_space<vmem>>, vector<10x1xf32>
    tpu.vector_store %arg5[%c0_18, %c0_19], %53 {strides = array<i32>} : memref<10x1xf32, #tpu.memory_space<vmem>>, vector<10x1xf32>,
    %c0_20 = arith.constant 0 : index
    %c0_21 = arith.constant 0 : index
    %55 = vector.load %arg6[%c0_20, %c0_21] : memref<10x1xf32, #tpu.memory_space<vmem>>, vector<10x1xf32>
    %56 = vector.broadcast %25 : vector<1x128xf32> to vector<10x128xf32>
    %57 = arith.mulf %42, %56 : vector<10x128xf32>
    %cst_22 = arith.constant dense<0.000000e+00> : vector<10xf32>
    %58 = vector.multi_reduction <add>, %57, %cst_22 [1] : vector<10x128xf32> to vector<10xf32>
    %59 = vector.shape_cast %58 : vector<10xf32> to vector<10x1xf32>
    %60 = arith.addf %55, %59 : vector<10x1xf32>
    %c0_23 = arith.constant 0 : index
    %c0_24 = arith.constant 0 : index
    %61 = vector.load %arg6[%c0_23, %c0_24] : memref<10x1xf32, #tpu.memory_space<vmem>>, vector<10x1xf32>
    tpu.vector_store %arg6[%c0_23, %c0_24], %60 {strides = array<i32>} : memref<10x1xf32, #tpu.memory_space<vmem>>, vector<10x1xf32>,
    %c0_i32_25 = arith.constant 0 : i32
    %62 = arith.cmpi eq, %arg0, %c0_i32_25 : i32
    %63 = arith.extui %62 : i1 to i32
    %c0_i32_26 = arith.constant 0 : i32
    %64 = arith.cmpi ne, %63, %c0_i32_26 : i32
    scf.if %64 {
      %c0_27 = arith.constant 0 : index
      %c0_28 = arith.constant 0 : index
      %65 = vector.load %arg4[%c0_27, %c0_28] : memref<10x1xf32, #tpu.memory_space<vmem>>, vector<10x1xf32>
      %cst_29 = arith.constant 6.400000e+01 : f32
      %66 = vector.broadcast %cst_29 : f32 to vector<10x1xf32>
      %67 = arith.divf %65, %66 : vector<10x1xf32>
      %cst_30 = arith.constant 1.000000e+00 : f32
      %68 = vector.broadcast %cst_30 : f32 to vector<10x1xf32>
      %69 = arith.maximumf %65, %68 : vector<10x1xf32>
      %c0_31 = arith.constant 0 : index
      %c0_32 = arith.constant 0 : index
      %70 = vector.load %arg5[%c0_31, %c0_32] : memref<10x1xf32, #tpu.memory_space<vmem>>, vector<10x1xf32>
      %71 = arith.divf %70, %69 : vector<10x1xf32>
      %c0_33 = arith.constant 0 : index
      %c0_34 = arith.constant 0 : index
      %72 = vector.load %arg6[%c0_33, %c0_34] : memref<10x1xf32, #tpu.memory_space<vmem>>, vector<10x1xf32>
      %73 = arith.divf %72, %69 : vector<10x1xf32>
      %74 = arith.subf %71, %73 : vector<10x1xf32>
      %75 = math.absf %74 : vector<10x1xf32>
      %cst_35 = arith.constant 0.000000e+00 : f32
      %76 = vector.broadcast %cst_35 : f32 to vector<10x1xf32>
      %77 = arith.cmpf ogt, %65, %76 : vector<10x1xf32>
      %78 = arith.mulf %75, %67 : vector<10x1xf32>
      %cst_36 = arith.constant 0.000000e+00 : f32
      %79 = vector.broadcast %cst_36 : f32 to vector<10x1xf32>
      %80 = arith.select %77, %78, %79 : vector<10x1xi1>, vector<10x1xf32>
      %cst_37 = arith.constant dense<0.000000e+00> : vector<1xf32>
      %81 = vector.multi_reduction <add>, %80, %cst_37 [0] : vector<10x1xf32> to vector<1xf32>
      %82 = vector.shape_cast %81 : vector<1xf32> to vector<1x1xf32>
      %c0_38 = arith.constant 0 : index
      %c0_39 = arith.constant 0 : index
      %83 = vector.load %arg3[%c0_38, %c0_39] : memref<1x1xf32, #tpu.memory_space<vmem>>, vector<1x1xf32>
      tpu.vector_store %arg3[%c0_38, %c0_39], %82 {strides = array<i32>} : memref<1x1xf32, #tpu.memory_space<vmem>>, vector<1x1xf32>,
    } else {
    }
    return
  }
  func.func @transform_0(%arg0: i32) -> (i32, i32) {
    %c0_i32 = arith.constant 0 : i32
    %c0_i32_0 = arith.constant 0 : i32
    return %c0_i32, %arg0 : i32, i32
  }
  func.func @transform_1(%arg0: i32) -> (i32, i32) {
    %c0_i32 = arith.constant 0 : i32
    %c0_i32_0 = arith.constant 0 : i32
    return %c0_i32, %arg0 : i32, i32
  }
  func.func @transform_2(%arg0: i32) -> (i32, i32) {
    %c0_i32 = arith.constant 0 : i32
    %c0_i32_0 = arith.constant 0 : i32
    %c0_i32_1 = arith.constant 0 : i32
    return %c0_i32, %c0_i32_0 : i32, i32
  }
}

</mosaic_0001>

<bundles_post_ra>
// kernel: tpu_custom_call.1
= control target key start
LH: loop header
LB: loop body
LE: loop exit
PB: predicated region body
PF: predicated region fallthrough
CT: control target
= control target key end

     0   :  { %7 = vsyncpa [#allocation6], 0  ;;  %s388_s0 = inlined_call_operand.hbm [shape: f32[8,64], index: 0, kind: input, shape index: {}]   ;;  %s389_s1 = inlined_call_operand.hbm [shape: s32[1,64], index: 1, kind: input, shape index: {}]   ;;  %s390_s2 = inlined_call_operand.hbm [shape: f32[1,1], index: 2, kind: output, shape index: {}]  }
   0x1   :  { %8 = vsyncpa [#allocation9], 0 }
   0x2   :  { %9 = vsyncpa [#allocation7], 0  ;;  %s15_s11 = sshll.u32 %s388_s0, 4  ;;  %s336_s12 = smov [#allocation5]   ;;  %s16_s11 = int_to_ptr.hbm [resolvable:$true] %s15_s11 }
   0x3   :  { %s17_s13 = sshll.u32 %s336_s12, 4  ;;  %s26_s16 = sshll.u32 %s389_s1, 4  ;;  %s18_s13 = int_to_ptr.vmem [resolvable:$true] %s17_s13  ;;  %s27_s16 = int_to_ptr.hbm [resolvable:$true] %s26_s16 }
   0x4   :  { %20 = dma.hbm_to_vmem [thread:$0]  %s16_s11, 128, %s18_s13, [#allocation6]  }
   0x5   :  { %s337_s17 = smov [#allocation8]  }
   0x6   :  { %s28_s18 = sshll.u32 %s337_s17, 4  ;;  %s29_s18 = int_to_ptr.vmem [resolvable:$true] %s28_s18 }
   0x7   :  { %31 = dma.hbm_to_vmem [thread:$0]  %s27_s16, 16, %s29_s18, [#allocation9]  }
   0x8   :  { %330 = dma.done.wait [#allocation6], 128  }
   0x9   :  { %331 = vsyncadd [#allocation6], 4294967168 }
   0xa   :  { %332 = dma.done.wait [#allocation9], 16  }
   0xb   :  { %333 = vsyncadd [#allocation9], 4294967280  ;;  %v52_v0 = vlaneseq  ;;  %v338_v1 = vmov 10.0   ;;  %v72_v5 = vld [vmem:[#allocation5] sm:$0xff]  ;;  %vm44_vm2 = vcmask 7168   ;;  %v339_v26 = vmov 0.0  }
   0xc   :  { %250 = vrcp.f32 %v338_v1  ;;  %v74_v7 = vrot.slane %v72_v5, 4  ;;  %45 = vst.msk [vmem:[#allocation2] sm:$0xff] %vm44_vm2, %v339_v26  ;;  %vm113_vm11 = vcmask 1041408   ;;  %v73_v40 = vld [vmem:[#allocation8] sm:$0x1]  ;;  %vm46_vm15 = vcmask 1024  }
   0xd   :  { %v53_v2 = vshrl.u32 %v52_v0, 7  ;;  %v71_v13 = vand.u32 127, %v52_v0  ;;  %48 = vst.msk [vmem:[#allocation3] sm:$0xff] %vm44_vm2, %v339_v26  ;;  %v340_v59 = vmov 64.0   ;;  %s341_s0 = smov [#allocation10]   ;;  %s230_s21 = sshll.u32 %s390_s2, 4  ;;  %s231_s21 = int_to_ptr.hbm [resolvable:$true] %s230_s21 }
   0xe   :  { %v75_v11 = vmax.f32 %v72_v5, %v74_v7  ;;  %50 = vst.msk [vmem:[#allocation4] sm:$0xff] %vm44_vm2, %v339_v26  ;;  %252 = vrcp.f32 %v340_v59  ;;  %s228_s1 = sshll.u32 %s341_s0, 4  ;;  %s229_s1 = int_to_ptr.vmem [resolvable:$true] %s228_s1 }
   0xf   :  { %v54_v3 = vadd.s32 8, %v53_v2  ;;  %v55_v8 = vcvt.s32.f32 %v53_v2  ;;  %vm97_vm1 = vcmp.lt.s32.totalorder %v71_v13, 64  ;;  %47 = vst.msk [vmem:[#allocation2 + $0x8] sm:$0x3] %vm46_vm15, %v339_v26 }
  0x10   :  { %v76_v14 = vrot.slane %v75_v11, 2  ;;  %49 = vst.msk [vmem:[#allocation3 + $0x8] sm:$0x3] %vm46_vm15, %v339_v26 }
  0x11   :  { %v56_v9 = vcvt.s32.f32 %v54_v3  ;;  %v66_v15 = vadd.f32 1.0, %v55_v8  ;;  %51 = vst.msk [vmem:[#allocation4 + $0x8] sm:$0x3] %vm46_vm15, %v339_v26 }
  0x12   :  { %v251_v4 = vpop.eup %250  ;;  %v77_v18 = vmax.f32 %v75_v11, %v76_v14 }
  0x13   :  { %v58_v6 = vmul.f32 10.0, %v251_v4  ;;  %vm62_vm0 = vweird.f32 %v251_v4  ;;  %v67_v16 = vadd.f32 1.0, %v56_v9  ;;  %v109_v47 = vld [vmem:[#allocation2] sm:$0xff] }
  0x14   :  { %v78_v20 = vrot.slane %v77_v18, 1  ;;  %v123_v49 = vld [vmem:[#allocation3] sm:$0xff]  ;;  %v253_v63 = vpop.eup %252 }
  0x15   :  { %v59_v10 = vsub.f32 1.0, %v58_v6  ;;  %v136_v62 = vld [vmem:[#allocation4] sm:$0xff] }
  0x16   :  { %v79_v25 = vmax.f32 %v77_v18, %v78_v20  ;;  %v110_v53 = vld [vmem:[#allocation2 + $0x8] sm:$0x3] }
  0x17   :  { %v60_v12 = vmul.f32 %v251_v4, %v59_v10  ;;  %v124_v55 = vld [vmem:[#allocation3 + $0x8] sm:$0x3] }
  0x18   :  { %v98_v27 = vsel %vm97_vm1, %v79_v25, 0.0  ;;  %vm80_vm3 = vcmp.eq.f32.partialorder %v72_v5, %v79_v25 }
  0x19   :  { %v61_v17 = vadd.f32 %v251_v4, %v60_v12  ;;  %v81_v28 = vsel %vm80_vm3, %v53_v2, 8 }
  0x1a   :  { %v82_v30 = vrot.slane %v81_v28, 4 }
  0x1b   :  { %v63_v19 = vsel %vm62_vm0, %v251_v4, %v61_v17  ;;  %v156_v4 = vmul.f32 64.0, %v253_v63 }
  0x1c   :  { %v64_v21 = vmul.f32 %v63_v19, %v55_v8  ;;  %v68_v22 = vmul.f32 %v66_v15, %v63_v19  ;;  %v65_v23 = vmul.f32 %v63_v19, %v56_v9  ;;  %v69_v24 = vmul.f32 %v67_v16, %v63_v19  ;;  %v137_v8 = vld [vmem:[#allocation4 + $0x8] sm:$0x3] }
  0x1d   :  { %vm83_vm10 = vcmp.lt.s32.totalorder %v81_v28, %v82_v30  ;;  %v157_v9 = vsub.f32 1.0, %v156_v4 }
  0x1e   :  { %vm99_vm4 = vcmp.gt.f32.partialorder %v98_v27, %v64_v21  ;;  %vm101_vm5 = vcmp.le.f32.partialorder %v98_v27, %v68_v22  ;;  %vm100_vm6 = vcmp.gt.f32.partialorder %v98_v27, %v65_v23  ;;  %vm102_vm7 = vcmp.le.f32.partialorder %v98_v27, %v69_v24 }
  0x1f   :  { %vm103_vm8 = vmand %vm99_vm4, %vm101_vm5  ;;  %v84_v33 = vsel %vm83_vm10, %v81_v28, %v82_v30  ;;  %v158_v17 = vmul.f32 %v253_v63, %v157_v9  ;;  %vm160_vm5 = vweird.f32 %v253_v63 }
  0x20   :  { %v242_v29 = vsel %vm103_vm8, 1.0, %v339_v26  ;;  %vm104_vm9 = vmand %vm100_vm6, %vm102_vm7  ;;  %v85_v34 = vrot.slane %v84_v33, 2 }
  0x21   :  { %111 = vadd.xlane.f32.xlu0 %v242_v29  ;;  %v125_v31 = vmul.f32 %v242_v29, %v98_v27  ;;  %v243_v32 = vsel %vm104_vm9, 1.0, %v339_v26 }
  0x22   :  { %v126_v35 = vmul.f32 %v243_v32, %v98_v27  ;;  %v114_v36 = vsel %vm113_vm11, %v243_v32, 0.0  ;;  %vm86_vm12 = vcmp.lt.s32.totalorder %v84_v33, %v85_v34  ;;  %v159_v27 = vadd.f32 %v253_v63, %v158_v17 }
  0x23   :  { %127 = vadd.xlane.f32.xlu1 %v125_v31  ;;  %v87_v37 = vsel %vm86_vm12, %v84_v33, %v85_v34  ;;  %vm221_vm12 = vcmask 0  }
  0x24   :  { %v88_v38 = vrot.slane %v87_v37, 1  ;;  %v129_v39 = vsel %vm113_vm11, %v126_v35, 0.0  ;;  %v161_v33 = vsel %vm160_vm5, %v253_v63, %v159_v27 }
  0x26   :  { %vm89_vm13 = vcmp.lt.s32.totalorder %v87_v37, %v88_v38 }
  0x27   :  { %v90_v41 = vsel %vm89_vm13, %v87_v37, %v88_v38 }
  0x28   :  { %vm91_vm14 = vcmp.eq.s32.totalorder %v90_v41, %v73_v40 }
  0x29   :  { %115 = vadd.xlane.f32.xlu0 %v114_v36  ;;  %v241_v42 = vsel %vm91_vm14, 1.0, %v339_v26 }
  0x2a   :  { %v138_v43 = vperm.slane %v241_v42, 0 }
  0x2b   :  { %130 = vadd.xlane.f32.xlu1 %v129_v39 }
  0x2c   :  { %v139_v44 = vmul.f32 %v242_v29, %v138_v43  ;;  %v140_v45 = vmul.f32 %v243_v32, %v138_v43 }
  0x2e   :  { %141 = vadd.xlane.f32.xlu2 %v139_v44  ;;  %v143_v46 = vsel %vm113_vm11, %v140_v45, 0.0 }
  0x36   :  { %144 = vadd.xlane.f32.xlu2 %v143_v46 }
  0x94   :  { %v112_v48 = vpop.xlane.xlu0 %111 }
  0x95   :  { %v117_v50 = vadd.f32 %v112_v48, %v109_v47 }
  0x96   :  { %v128_v51 = vpop.xlane.xlu1 %127 }
  0x97   :  { %120 = vst.msk [vmem:[#allocation2] sm:$0xff] %vm44_vm2, %v117_v50  ;;  %v132_v52 = vadd.f32 %v128_v51, %v123_v49 }
  0x99   :  { %134 = vst.msk [vmem:[#allocation3] sm:$0xff] %vm44_vm2, %v132_v52 }
  0x9c   :  { %v116_v54 = vpop.xlane.xlu0 %115 }
  0x9d   :  { %v118_v56 = vadd.f32 %v116_v54, %v110_v53 }
  0x9e   :  { %v131_v57 = vpop.xlane.xlu1 %130  ;;  %v374_v58 = vld [vmem:[#allocation2] sm:$0xff] }
  0x9f   :  { %122 = vst.msk [vmem:[#allocation2 + $0x8] sm:$0x3] %vm46_vm15, %v118_v56  ;;  %v133_v60 = vadd.f32 %v131_v57, %v124_v55  ;;  %v164_v61 = vmax.f32 %v374_v58, 1.0  ;;  %v162_v40 = vmul.f32 %v161_v33, %v374_v58  ;;  %vm206_vm10 = vcmp.gt.f32.partialorder %v374_v58, 0.0 }
  0xa0   :  { %v166_v18 = vld [vmem:[#allocation3] sm:$0xff] }
  0xa1   :  { %135 = vst.msk [vmem:[#allocation3 + $0x8] sm:$0x3] %vm46_vm15, %v133_v60  ;;  %254 = vrcp.f32 %v164_v61  ;;  %v142_v0 = vpop.xlane.xlu2 %141  ;;  %v179_v10 = vand.u32 2147483648, %v164_v61  ;;  %v177_v12 = vand.u32 2147483647, %v164_v61  ;;  %vm173_vm1 = vweird.f32 %v164_v61 }
  0xa2   :  { %v146_v1 = vadd.f32 %v142_v0, %v136_v62 }
  0xa3   :  { %v180_v19 = vor.u32 1.1754944e-38, %v179_v10  ;;  %vm178_vm4 = vcmp.eq.f32.partialorder %v177_v12, 8.507059e+37 }
  0xa4   :  { %148 = vst.msk [vmem:[#allocation4] sm:$0xff] %vm44_vm2, %v146_v1 }
  0xa6   :  { %v154_v2 = vld [vmem:[#allocation2 + $0x8] sm:$0x3] }
  0xa7   :  { %v255_v3 = vpop.eup %254  ;;  %v165_v5 = vmax.f32 %v154_v2, 1.0  ;;  %v163_v45 = vmul.f32 %v161_v33, %v154_v2  ;;  %vm207_vm11 = vcmp.gt.f32.partialorder %v154_v2, 0.0 }
  0xa8   :  { %v169_v6 = vmul.f32 %v255_v3, %v164_v61  ;;  %vm174_vm0 = vweird.f32 %v255_v3  ;;  %v167_v34 = vld [vmem:[#allocation3 + $0x8] sm:$0x3] }
  0xa9   :  { %256 = vrcp.f32 %v165_v5  ;;  %v145_v13 = vpop.xlane.xlu2 %144  ;;  %vm175_vm3 = vmor %vm173_vm1, %vm174_vm0  ;;  %v194_v28 = vand.u32 2147483648, %v165_v5  ;;  %v192_v30 = vand.u32 2147483647, %v165_v5  ;;  %vm188_vm7 = vweird.f32 %v165_v5 }
  0xaa   :  { %v170_v7 = vsub.f32 1.0, %v169_v6  ;;  %v147_v14 = vadd.f32 %v145_v13, %v137_v8 }
  0xab   :  { %v198_v20 = vld [vmem:[#allocation4] sm:$0xff]  ;;  %v195_v35 = vor.u32 1.1754944e-38, %v194_v28  ;;  %vm193_vm9 = vcmp.eq.f32.partialorder %v192_v30, 8.507059e+37 }
  0xac   :  { %v171_v11 = vmul.f32 %v255_v3, %v170_v7  ;;  %149 = vst.msk [vmem:[#allocation4 + $0x8] sm:$0x3] %vm46_vm15, %v147_v14 }
  0xae   :  { %v172_v15 = vadd.f32 %v255_v3, %v171_v11 }
  0xaf   :  { %v257_v16 = vpop.eup %256 }
  0xb0   :  { %v176_v21 = vsel %vm175_vm3, %v255_v3, %v172_v15  ;;  %v184_v22 = vmul.f32 %v257_v16, %v165_v5  ;;  %vm189_vm6 = vweird.f32 %v257_v16 }
  0xb1   :  { %v181_v23 = vsel %vm178_vm4, %v180_v19, %v176_v21  ;;  %vm190_vm8 = vmor %vm188_vm7, %vm189_vm6 }
  0xb2   :  { %v182_v24 = vmul.f32 %v181_v23, %v166_v18  ;;  %v185_v25 = vsub.f32 1.0, %v184_v22  ;;  %v200_v26 = vmul.f32 %v198_v20, %v181_v23 }
  0xb3   :  { %v199_v36 = vld [vmem:[#allocation4 + $0x8] sm:$0x3] }
  0xb4   :  { %v186_v29 = vmul.f32 %v257_v16, %v185_v25  ;;  %v202_v31 = vsub.f32 %v182_v24, %v200_v26 }
  0xb6   :  { %v187_v32 = vadd.f32 %v257_v16, %v186_v29  ;;  %v204_v38 = vand.u32 2147483647, %v202_v31 }
  0xb8   :  { %v191_v37 = vsel %vm190_vm8, %v257_v16, %v187_v32  ;;  %v208_v44 = vmul.f32 %v204_v38, %v162_v40 }
  0xb9   :  { %v196_v39 = vsel %vm193_vm9, %v195_v35, %v191_v37 }
  0xba   :  { %v197_v41 = vmul.f32 %v196_v39, %v167_v34  ;;  %v201_v42 = vmul.f32 %v199_v36, %v196_v39  ;;  %v210_v48 = vsel %vm206_vm10, %v208_v44, 0.0 }
  0xbb   :  { %v212_v50 = vsel %vm44_vm2, %v210_v48, 0.0 }
  0xbc   :  { %v203_v43 = vsub.f32 %v197_v41, %v201_v42 }
  0xbe   :  { %v205_v46 = vand.u32 2147483647, %v203_v43 }
  0xc0   :  { %v209_v47 = vmul.f32 %v205_v46, %v163_v45 }
  0xc2   :  { %v211_v49 = vsel %vm207_vm11, %v209_v47, 0.0 }
  0xc3   :  { %v213_v51 = vsel %vm46_vm15, %v211_v49, 0.0 }
  0xc4   :  { %v214_v52 = vadd.f32 %v213_v51, %v212_v50 }
  0xc6   :  { %v215_v53 = vrot.slane %v214_v52, 4 }
  0xc8   :  { %v216_v54 = vadd.f32 %v215_v53, %v214_v52 }
  0xca   :  { %v217_v55 = vrot.slane %v216_v54, 2 }
  0xcc   :  { %v218_v56 = vadd.f32 %v217_v55, %v216_v54 }
  0xce   :  { %v219_v57 = vrot.slane %v218_v56, 1 }
  0xd0   :  { %v220_v58 = vadd.f32 %v219_v57, %v218_v56 }
  0xd2   :  { %222 = vst.msk [vmem:[#allocation10] sm:$0x1] %vm221_vm12, %v220_v58 }
  0xd3   :  { %233 = dma.vmem_to_hbm [thread:$0]  %s229_s1, 16, %s231_s21, [#allocation7]  }
  0xd4   :  { %334 = dma.done.wait [#allocation7], 16  }
  0xd5   :  { %335 = vsyncadd [#allocation7], 4294967280 }
  0xd6   :  { %238 = vsyncpa [#allocation6], 1 }
  0xd7   :  { %239 = vsyncpa [#allocation9], 1 }
  0xd8   :  { %240 = vsyncpa [#allocation7], 1 }

</bundles_post_ra>
